<compile_context>
chip_gen: v6e
topology: v6e:2x2x1
jax: 0.10.0
libtpu: 0.0.40
codegen_flags: <defaults>
</compile_context>

<pallas_src>
import functools

import jax
import jax.numpy as jnp
from jax.experimental import pallas as pl
from jax.experimental.pallas import tpu as pltpu


LANES = 128                      # vreg lane width
SUBLANES = 8                     # f32 sublane count
WIDE_COLS = 4096                 # wide lane-dense row width for large slabs
TARGET_BLOCK_BYTES = 1 << 20     # ~1 MiB per pipelined block buffer


def _round_up(n, m):
    return ((n + m - 1) // m) * m


def _add_scaled_noise_kernel(x_ref, noise_ref, o_ref, *, ratio):
    # Pure elementwise: out = x + ratio * N(0, 1)
    o_ref[...] = x_ref[...] + jnp.asarray(ratio, dtype=o_ref.dtype) * noise_ref[...]


def _choose_layout(n, itemsize):
    """Pick (rows, cols, block_rows) for a flat slab of n elements."""
    cols = WIDE_COLS if n >= SUBLANES * WIDE_COLS else LANES
    rows = _round_up(pl.cdiv(n, cols), SUBLANES)
    max_block_rows = max(
        SUBLANES,
        (TARGET_BLOCK_BYTES // (cols * itemsize)) // SUBLANES * SUBLANES,
    )
    block_rows = min(rows, max_block_rows)
    rows = _round_up(rows, block_rows)        # grid divides evenly
    return rows, cols, block_rows


def _fused_add_scaled_noise(x2d, noise2d, ratio, block_rows):
    rows, cols = x2d.shape
    grid = rows // block_rows
    spec = pl.BlockSpec((block_rows, cols), lambda i: (i, 0))
    kernel = functools.partial(_add_scaled_noise_kernel, ratio=float(ratio))
    return pl.pallas_call(
        kernel,
        out_shape=jax.ShapeDtypeStruct((rows, cols), x2d.dtype),
        grid=(grid,),
        in_specs=[spec, spec],
        out_specs=spec,
        input_output_aliases={0: 0},          # write result over the input slab
        compiler_params=pltpu.CompilerParams(
            dimension_semantics=("parallel",),
        ),
    )(x2d, noise2d)


class NoiseGenerator:
    """JAX/Pallas port of neuromancer NoiseGenerator.

    out[key + name] = data[key] + ratio * N(0, 1)   (same shape/dtype as input)
    """

    def __init__(self, ratio=0.05, keys=None, name="noise"):
        self.ratio = ratio
        self.keys = list(keys) if keys is not None else None
        self.name = name

    def _build_slab(self, data):
        flats, sizes, shapes, dtypes = [], [], [], []
        for k in self.keys:
            x = jnp.asarray(data[k])
            shapes.append(x.shape)
            dtypes.append(x.dtype)
            flats.append(jnp.ravel(x))
            sizes.append(x.size)
        slab_dtype = functools.reduce(jnp.promote_types, dtypes)
        if not jnp.issubdtype(slab_dtype, jnp.floating):
            slab_dtype = jnp.dtype(jnp.float32)
        flat = jnp.concatenate([f.astype(slab_dtype) for f in flats])
        n = flat.shape[0]
        rows, cols, block_rows = _choose_layout(n, jnp.dtype(slab_dtype).itemsize)
        n_pad = rows * cols
        if n_pad != n:
            flat = jnp.pad(flat, (0, n_pad - n))
        x2d = flat.reshape(rows, cols)
        return x2d, block_rows, n, sizes, shapes, dtypes

    def __call__(self, data, key, *, _reference=False):
        x2d, block_rows, n, sizes, shapes, dtypes = self._build_slab(data)
        noise2d = jax.random.normal(key, x2d.shape, dtype=x2d.dtype)
        if _reference:
            y2d = x2d + jnp.asarray(self.ratio, x2d.dtype) * noise2d
        else:
            y2d = _fused_add_scaled_noise(x2d, noise2d, self.ratio, block_rows)
        y = y2d.reshape(-1)
        if y.shape[0] != n:
            y = y[:n]
        out, off = {}, 0
        for k, sz, shp, dt in zip(self.keys, sizes, shapes, dtypes):
            out[k + self.name] = y[off:off + sz].reshape(shp).astype(dt)
            off += sz
        return out


if __name__ == "__main__":
    rng = jax.random.PRNGKey(0)
    k1, k2, k3 = jax.random.split(rng, 3)

    # Small deterministic inputs: seq x batch x features, plus an NCHW tensor.
    data = {
        "Y": jax.random.normal(k1, (8, 2, 4), dtype=jnp.float32),
        "U": jax.random.normal(k2, (8, 2, 3), dtype=jnp.float32),
        "X": jax.random.normal(k3, (2, 4, 16, 16), dtype=jnp.float32),
    }

    gen = NoiseGenerator(ratio=0.05, keys=["Y", "U", "X"], name="noise")
    noise_key = jax.random.PRNGKey(42)

    out = gen(data, noise_key)                       # Pallas path
    ref = gen(data, noise_key, _reference=True)      # pure-JAX path, same noise

    for v in out.values():
        jax.block_until_ready(v)

    for k in ["Y", "U", "X"]:
        ko = k + "noise"
        assert out[ko].shape == data[k].shape
        assert out[ko].dtype == data[k].dtype
        assert jnp.allclose(out[ko], ref[ko], rtol=1e-6, atol=1e-6)
        diff = out[ko] - data[k]
        assert float(jnp.max(jnp.abs(diff))) > 0.0       # noise was added
        assert float(jnp.max(jnp.abs(diff))) < 1.0       # 0.05 * gaussian is small

    print("KERNEL_OK")
</pallas_src>

<mosaic_0001>
module attributes {stable_mosaic.version = 11 : i64} {
  func.func @_add_scaled_noise_kernel(%arg0: i32, %arg1: memref<24x128xf32, #tpu.memory_space<vmem>>, %arg2: memref<24x128xf32, #tpu.memory_space<vmem>>, %arg3: memref<24x128xf32, #tpu.memory_space<vmem>>) attributes {dimension_semantics = [#tpu.dimension_semantics<parallel>], iteration_bounds = array<i64: 1>, scalar_prefetch = 0 : i64, scratch_operands = 0 : i64, tpu.core_type = #tpu.core_type<tc>, window_params = [{transform_indices = @transform_0, window_bounds = array<i64: 24, 128>}, {transform_indices = @transform_1, window_bounds = array<i64: 24, 128>}, {transform_indices = @transform_2, window_bounds = array<i64: 24, 128>}]} {
    %c0 = arith.constant 0 : index
    %c0_0 = arith.constant 0 : index
    %0 = vector.load %arg1[%c0, %c0_0] : memref<24x128xf32, #tpu.memory_space<vmem>>, vector<24x128xf32>
    %c0_1 = arith.constant 0 : index
    %c0_2 = arith.constant 0 : index
    %1 = vector.load %arg2[%c0_1, %c0_2] : memref<24x128xf32, #tpu.memory_space<vmem>>, vector<24x128xf32>
    %cst = arith.constant 5.000000e-02 : f32
    %2 = vector.broadcast %cst : f32 to vector<24x128xf32>
    %3 = arith.mulf %2, %1 : vector<24x128xf32>
    %4 = arith.addf %0, %3 : vector<24x128xf32>
    %c0_3 = arith.constant 0 : index
    %c0_4 = arith.constant 0 : index
    %5 = vector.load %arg3[%c0_3, %c0_4] : memref<24x128xf32, #tpu.memory_space<vmem>>, vector<24x128xf32>
    tpu.vector_store %arg3[%c0_3, %c0_4], %4 {strides = array<i32>} : memref<24x128xf32, #tpu.memory_space<vmem>>, vector<24x128xf32>,
    return
  }
  func.func @transform_0(%arg0: i32) -> (i32, i32) {
    %c0_i32 = arith.constant 0 : i32
    %c0_i32_0 = arith.constant 0 : i32
    return %arg0, %c0_i32 : i32, i32
  }
  func.func @transform_1(%arg0: i32) -> (i32, i32) {
    %c0_i32 = arith.constant 0 : i32
    %c0_i32_0 = arith.constant 0 : i32
    return %arg0, %c0_i32 : i32, i32
  }
  func.func @transform_2(%arg0: i32) -> (i32, i32) {
    %c0_i32 = arith.constant 0 : i32
    %c0_i32_0 = arith.constant 0 : i32
    return %arg0, %c0_i32 : i32, i32
  }
}

</mosaic_0001>

<bundles_post_ra>
// kernel: tpu_custom_call.1
= control target key start
LH: loop header
LB: loop body
LE: loop exit
PB: predicated region body
PF: predicated region fallthrough
CT: control target
= control target key end

     0   :  { %7 = vsyncpa [#allocation3], 0  ;;  %s146_s0 = inlined_call_operand.hbm [shape: f32[24,128], index: 0, kind: input, shape index: {}, may-alias: {0,2}]   ;;  %s147_s1 = inlined_call_operand.vmem [shape: f32[24,128], index: 1, kind: input, shape index: {}]   ;;  %s148_s2 = inlined_call_operand.hbm [shape: f32[24,128], index: 2, kind: output, shape index: {}, may-alias: {0,2}]  }
   0x1   :  { %8 = vsyncpa [#allocation4], 0  ;;  %s106_s9 = smov [#allocation2]  }
   0x2   :  { %s14_s10 = sshll.u32 %s106_s9, 4  ;;  %s15_s10 = int_to_ptr.vmem [resolvable:$true] %s14_s10 }
   0x3   :  { %s70_s11 = scalar_lea.vmem %s15_s10, 384  ;;  %p75_p1 = scmp.lt.s32.totalorder %s15_s10, %s15_s10 }
   0x4   :  { %p71_p0 = scmp.ne.s32.totalorder %s15_s10, %s70_s11  ;;  %p76_p2 = scmp.lt.s32.totalorder %s70_s11, %s70_s11 }
   0x6   :  { %p77_p3 = por %p76_p2, %p75_p1 }
   0x8   :  { %p78_p4 = pnand %p77_p3, %p71_p0 }
   0xa   :  { %81 = shalt.err (!%p78_p4)
}
   0xb   :  { %s107_s12 = smov 128   ;;  %s108_s13 = smov 8  }
   0xc   :  { %20 = dma.hbm_to_vmem [thread:$0]  %s146_s0, 384, %s15_s10, [#allocation3], %s107_s12, %s107_s12, %s108_s13  }
   0xd   :  { %102 = dma.done.wait [#allocation3], 384  }
   0xe   :  { %103 = vsyncadd [#allocation3], 4294966912  ;;  %v26_v0 = vld [vmem:[#allocation2] sm:$0xff]  ;;  %v27_v2 = vld [vmem:[#allocation2 + $0x8] sm:$0xff]  ;;  %s109_s22 = smov [#allocation5]  }
   0xf   :  { %v29_v1 = vld [vmem:[%s147_s1] sm:$0xff]  ;;  %v30_v4 = vld [vmem:[%s147_s1 + $0x8] sm:$0xff]  ;;  %v28_v5 = vld [vmem:[#allocation2 + $0x10] sm:$0xff]  ;;  %s46_s0 = sshll.u32 %s109_s22, 4  ;;  %s47_s0 = int_to_ptr.vmem [resolvable:$true] %s46_s0 }
  0x10   :  { %v32_v3 = vmul.f32 0.05, %v29_v1  ;;  %v31_v6 = vld [vmem:[%s147_s1 + $0x10] sm:$0xff]  ;;  %v33_v7 = vmul.f32 0.05, %v30_v4  ;;  %s82_s23 = scalar_lea.vmem %s47_s0, 384  ;;  %p87_p6 = scmp.lt.s32.totalorder %s47_s0, %s47_s0 }
  0x11   :  { %v34_v8 = vmul.f32 0.05, %v31_v6  ;;  %p83_p5 = scmp.ne.s32.totalorder %s47_s0, %s82_s23  ;;  %p88_p7 = scmp.lt.s32.totalorder %s82_s23, %s82_s23 }
  0x12   :  { %v35_v9 = vadd.f32 %v32_v3, %v26_v0  ;;  %v36_v10 = vadd.f32 %v33_v7, %v27_v2 }
  0x13   :  { %v37_v11 = vadd.f32 %v34_v8, %v28_v5  ;;  %p89_p8 = por %p88_p7, %p87_p6 }
  0x14   :  { %38 = vst [vmem:[#allocation5] sm:$0xff] %v35_v9  ;;  %39 = vst [vmem:[#allocation5 + $0x8] sm:$0xff] %v36_v10 }
  0x15   :  { %40 = vst [vmem:[#allocation5 + $0x10] sm:$0xff] %v37_v11  ;;  %p90_p9 = pnand %p89_p8, %p83_p5 }
  0x17   :  { %93 = shalt.err (!%p90_p9)
}
  0x18   :  { %52 = dma.vmem_to_hbm [thread:$0]  %s47_s0, 384, %s148_s2, [#allocation4], %s107_s12, %s107_s12, %s108_s13  }
  0x19   :  { %104 = dma.done.wait [#allocation4], 384  }
  0x1a   :  { %105 = vsyncadd [#allocation4], 4294966912 }
  0x1b   :  { %56 = vsyncpa [#allocation3], 1 }
  0x1c   :  { %57 = vsyncpa [#allocation4], 1 }

</bundles_post_ra>
